<compile_context>
chip_gen: v5e
topology: v5e:2x2
jax: 0.10.0
libtpu: 0.0.40
codegen_flags: <defaults>
</compile_context>

<pallas_src>
import functools

import jax
import jax.numpy as jnp
from jax import lax
from jax.experimental import pallas as pl
from jax.experimental.pallas import tpu as pltpu


_MIB = 1024 * 1024
_ENC_BUF_TARGET = 4 * _MIB   # ~2-4 MiB/buffer already reaches ~85% of HBM roofline


def _round_up(x, m):
    return ((x + m - 1) // m) * m


def _tpu_caps():
    """Return (physical VMEM bytes per TensorCore, has-2-TensorCores)."""
    vmem_cap = 64 * _MIB                     # conservative fallback (v7x per-TC)
    try:
        info = pltpu.get_tpu_info()
        vmem_cap = int(getattr(info, "vmem_capacity_bytes", vmem_cap))
    except Exception:
        pass
    kind = ""
    try:
        kind = jax.devices()[0].device_kind.lower()
    except Exception:
        pass
    # v7x (and megacore v4/v5p) expose 2 TensorCores; v5e/v6e have 1.  Only on
    # 2-TC parts does splitting the batch grid axis buy extra HBM bandwidth.
    two_tc = ("7" in kind) or ("v4" in kind) or ("v5p" in kind)
    return vmem_cap, two_tc


def _bilinear_attn_kernel(u_ref, enc_ref, out_ref, *, t_total, t_block, t_pad):
    """One (batch-block, T-tile) grid step.

    u_ref:   (Bt, H)           hidden @ W for this batch block
    enc_ref: (Tt, Bt, H)       encoder_output tile in native (T, B, H) layout
    out_ref: (1, nT, Bt, Tt)   f32 score slab, VMEM-resident across the T
                               axis; T sits on the lane axis (dense stores).
    """
    t_idx = pl.program_id(1)
    nt = pl.num_programs(1)

    # score[t, b] = sum_h enc[t, b, h] * u[b, h].
    # Multiply in the input dtype (bf16 is native on v6e/v7x VPU); only the
    # reduction accumulates in f32.  The kernel is HBM-bound (~0.5 flop/byte);
    # an MXU formulation of this skinny contraction yields lane-sparse (N, 1)
    # results whose relayout costs more than the XLU lane-reduce it replaces,
    # so the reduce stays on the (otherwise idle-enough) VPU/XLU path.
    enc = enc_ref[...]                                   # (Tt, Bt, H)
    u = u_ref[...].astype(enc.dtype)                     # (Bt, H) tiny cast
    prod = (enc * u[None, :, :]).astype(jnp.float32)     # f32 accumulation
    s_tb = jnp.sum(prod, axis=-1)                        # (Tt, Bt)
    s_bt = jnp.transpose(s_tb)                           # (Bt, Tt): T on lanes

    # Full-plane store: dynamic index only on a major dim, static dense
    # (sublane, lane) layout -> unmasked full-width stores into the slab.
    out_ref[0, t_idx] = s_bt

    # Last T tile for this batch block: softmax in place over the resident
    # (nT, Bt, Tt) slab (same output block index across the "arbitrary" T
    # axis => it stays in VMEM until the batch block changes).
    @pl.when(t_idx == nt - 1)
    def _finalize():
        score = out_ref[0]                               # (nT, Bt, Tt) f32
        if t_pad > t_total:                              # mask padded T tail
            t_glob = (lax.broadcasted_iota(jnp.int32, score.shape, 0) * t_block
                      + lax.broadcasted_iota(jnp.int32, score.shape, 2))
            score = jnp.where(t_glob < t_total, score, -jnp.inf)
        m = jnp.max(jnp.max(score, axis=2, keepdims=True),
                    axis=0, keepdims=True)               # (1, Bt, 1)
        e = jnp.exp(score - m)
        d = jnp.sum(jnp.sum(e, axis=2, keepdims=True),
                    axis=0, keepdims=True)               # (1, Bt, 1)
        out_ref[0] = e * pl.reciprocal(d, approx=False)


def _pick_blocks(B, T, H, enc_dtype, budget, two_tc, b_block=None, t_block=None):
    itemsize = jnp.dtype(enc_dtype).itemsize
    packing = max(1, 4 // itemsize)              # sublane packing (1 f32, 2 bf16)

    def enc_row_bytes(bb):                       # one T-row of an enc tile, padded
        return _round_up(bb, 8 * packing) * _round_up(H, 128) * itemsize

    def slab_bytes(bb, t_pad):                   # f32 score slab, double-buffered
        return 2 * _round_up(bb, 8) * _round_up(t_pad, 128) * 4

    def u_bytes(bb):                             # u block, double-buffered
        return 2 * _round_up(bb, 8) * _round_up(H, 128) * 4

    # ---- batch block --------------------------------------------------------
    if b_block is not None:
        b_blk = max(1, min(int(b_block), B))
    elif two_tc and B >= 16:
        # >= 2 "parallel" blocks so both TensorCores get work.
        b_blk = min(_round_up(pl.cdiv(B, 2), 8), B)
    else:
        # Single TC: one batch block = fewer grid steps and bigger DMAs.
        b_blk = B

    # ---- T tile -------------------------------------------------------------
    while True:
        if t_block is not None:
            t_blk = max(1, min(int(t_block), T))
            break
        avail = budget - slab_bytes(b_blk, _round_up(T, 128)) - u_bytes(b_blk)
        per_buf = min(max(avail // 2, 0), _ENC_BUF_TARGET)
        t_blk = per_buf // enc_row_bytes(b_blk)
        if t_blk >= T:
            t_blk = T                            # single tile
            break
        if t_blk >= 128:
            t_blk = (t_blk // 128) * 128         # lane-dense slab planes
            break
        if b_blk > 8 and b_block is None:
            # Tile rows too fat for a 128-deep tile: shrink the batch block
            # (more grid steps, but tiles stay lane-dense and within budget).
            b_blk = max(8, _round_up(b_blk // 2, 8))
            continue
        # Very large H and/or T: accept a small tile.
        # TODO(synk): for extreme T (slab alone exceeds the budget) switch to a
        # streaming-score variant (per-T-tile output blocks + running max/sum
        # scratch + a second normalization pass) instead of the resident slab.
        t_blk = max(1, min(T, 128))
        break
    return b_blk, t_blk


def bilinear_attn(hidden, encoder_output, weight, bias,
                  b_block=None, t_block=None):
    """hidden: [1, B, H], encoder_output: [T, B, H] -> energy [B, 1, T].

    weight/bias are the PyTorch nn.Linear(H, H) parameters
    (weight[h_out, h_in], bias[h_out]).
    """
    _, B, H = hidden.shape
    T = encoder_output.shape[0]

    # Tiny hoisted precompute (O(B*H^2) << O(T*B*H)): u = hidden @ W.
    # The Linear bias adds a per-batch constant to every score, which cancels
    # inside the softmax, so it is dropped (kept in the signature for parity).
    del bias
    u = jnp.dot(hidden[0], weight, precision=lax.Precision.HIGHEST)    # (B, H)

    vmem_cap, two_tc = _tpu_caps()
    budget = min(int(vmem_cap * 0.7), 96 * _MIB)  # ~45 MiB v7x, ~90 MiB v5e/v6e
    b_blk, t_blk = _pick_blocks(B, T, H, encoder_output.dtype, budget, two_tc,
                                b_block, t_block)
    nb = pl.cdiv(B, b_blk)
    nt = pl.cdiv(T, t_blk)
    t_pad = nt * t_blk

    # Exact VMEM footprint ((8,128) tile padding + Pallas double buffering),
    # handed to the compiler so the tiling choice actually holds.
    itemsize = encoder_output.dtype.itemsize
    packing = max(1, 4 // itemsize)
    enc_buf = t_blk * _round_up(b_blk, 8 * packing) * _round_up(H, 128) * itemsize
    u_buf = _round_up(b_blk, 8) * _round_up(H, 128) * 4
    slab_buf = nt * _round_up(b_blk, 8) * _round_up(t_blk, 128) * 4
    footprint = 2 * (enc_buf + u_buf + slab_buf)
    vmem_limit = max(footprint + footprint // 4 + 2 * _MIB, 32 * _MIB)
    vmem_limit = min(vmem_limit, max(vmem_cap - 4 * _MIB, footprint + 2 * _MIB))

    kernel = functools.partial(_bilinear_attn_kernel,
                               t_total=T, t_block=t_blk, t_pad=t_pad)

    grid_spec = pltpu.PrefetchScalarGridSpec(
        num_scalar_prefetch=0,
        grid=(nb, nt),
        in_specs=[
            pl.BlockSpec((b_blk, H), lambda b, t: (b, 0)),              # u
            pl.BlockSpec((t_blk, b_blk, H), lambda b, t: (t, b, 0)),    # enc
        ],
        out_specs=pl.BlockSpec((1, nt, b_blk, t_blk),
                               lambda b, t: (b, 0, 0, 0)),              # slab
    )

    cost = pl.CostEstimate(
        flops=2 * B * T * H + 6 * B * T,
        transcendentals=B * T,
        bytes_accessed=int(itemsize * T * B * H + 4 * B * H
                           + 12 * nb * b_blk * t_pad),
    )

    out = pl.pallas_call(
        kernel,
        out_shape=jax.ShapeDtypeStruct((nb, nt, b_blk, t_blk), jnp.float32),
        grid_spec=grid_spec,
        compiler_params=pltpu.CompilerParams(
            dimension_semantics=("parallel", "arbitrary"),
            vmem_limit_bytes=int(vmem_limit)),
        cost_estimate=cost,
    )(u, encoder_output)

    # (nb, nT, Bt, Tt) -> (B, 1, T).  This rearrangement touches only
    # B * T_pad f32 elements (~1/H of the enc traffic the kernel streams), so
    # it is negligible.
    out = out.transpose(0, 2, 1, 3).reshape(nb * b_blk, t_pad)
    return out[:B, :T].reshape(B, 1, T)


def reference(hidden, encoder_output, weight, bias):
    """Plain-JAX reference mirroring the PyTorch forward."""
    wh = jnp.einsum("tbh,oh->tbo", encoder_output, weight,
                    precision=lax.Precision.HIGHEST) + bias       # nn.Linear
    wh = jnp.transpose(wh, (1, 2, 0))                             # (B, H, T)
    score = jnp.einsum("bih,bht->bit", jnp.transpose(hidden, (1, 0, 2)), wh,
                       precision=lax.Precision.HIGHEST)
    return jax.nn.softmax(score, axis=2)


if __name__ == "__main__":
    def make_inputs(key, B, T, H):
        k1, k2, k3, k4 = jax.random.split(key, 4)
        hidden = jax.random.normal(k1, (1, B, H), dtype=jnp.float32)
        enc = jax.random.normal(k2, (T, B, H), dtype=jnp.float32)
        bound = 1.0 / (H ** 0.5)
        weight = jax.random.uniform(k3, (H, H), minval=-bound, maxval=bound,
                                    dtype=jnp.float32)
        bias = jax.random.uniform(k4, (H,), minval=-bound, maxval=bound,
                                  dtype=jnp.float32)
        return hidden, enc, weight, bias

    root = jax.random.PRNGKey(0)

    # (B, T, H, kwargs): small spec-sized shape; a multi-tile config with a
    # padded T remainder and 2 parallel batch blocks; and a non-128 T tile
    # with a sub-8 batch block (sublane-padded slab planes).
    configs = [
        (2, 8, 32, {}),
        (16, 200, 128, dict(b_block=8, t_block=128)),
        (4, 300, 64, dict(t_block=64)),
    ]
    for i, (B, T, H, kwargs) in enumerate(configs):
        hidden, enc, weight, bias = make_inputs(jax.random.fold_in(root, i),
                                                B, T, H)
        out = jax.block_until_ready(
            bilinear_attn(hidden, enc, weight, bias, **kwargs))
        ref = reference(hidden, enc, weight, bias)
        assert out.shape == (B, 1, T), (out.shape, (B, 1, T))
        assert jnp.allclose(out, ref, atol=1e-5, rtol=1e-5), (
            f"config {i}: max err {jnp.max(jnp.abs(out - ref))}")
        assert jnp.allclose(jnp.sum(out, axis=2), 1.0, atol=1e-5)

    print("KERNEL_OK")
</pallas_src>

<mosaic_0001>
module attributes {stable_mosaic.version = 11 : i64} {
  func.func @_bilinear_attn_kernel(%arg0: i32, %arg1: i32, %arg2: memref<2x32xf32, #tpu.memory_space<vmem>>, %arg3: memref<8x2x32xf32, #tpu.memory_space<vmem>>, %arg4: memref<1x1x2x8xf32, #tpu.memory_space<vmem>>) attributes {dimension_semantics = [#tpu.dimension_semantics<parallel>, #tpu.dimension_semantics<arbitrary>], iteration_bounds = array<i64: 1, 1>, scalar_prefetch = 0 : i64, scratch_operands = 0 : i64, tpu.core_type = #tpu.core_type<tc>, window_params = [{transform_indices = @transform_0, window_bounds = array<i64: 2, 32>}, {transform_indices = @transform_1, window_bounds = array<i64: 8, 2, 32>}, {transform_indices = @transform_2, window_bounds = array<i64: 1, 1, 2, 8>}]} {
    %c0 = arith.constant 0 : index
    %c0_0 = arith.constant 0 : index
    %c0_1 = arith.constant 0 : index
    %0 = vector.load %arg3[%c0, %c0_0, %c0_1] : memref<8x2x32xf32, #tpu.memory_space<vmem>>, vector<8x2x32xf32>
    %c0_2 = arith.constant 0 : index
    %c0_3 = arith.constant 0 : index
    %1 = vector.load %arg2[%c0_2, %c0_3] : memref<2x32xf32, #tpu.memory_space<vmem>>, vector<2x32xf32>
    %2 = vector.shape_cast %1 : vector<2x32xf32> to vector<1x2x32xf32>
    %3 = vector.broadcast %2 : vector<1x2x32xf32> to vector<8x2x32xf32>
    %4 = arith.mulf %0, %3 : vector<8x2x32xf32>
    %cst = arith.constant dense<0.000000e+00> : vector<8x2xf32>
    %5 = vector.multi_reduction <add>, %4, %cst [2] : vector<8x2x32xf32> to vector<8x2xf32>
    %6 = tpu.transpose %5, [1, 0] : vector<8x2xf32> -> vector<2x8xf32>
    %c0_4 = arith.constant 0 : index
    %7 = arith.index_cast %arg1 : i32 to index
    %c0_5 = arith.constant 0 : index
    %c0_6 = arith.constant 0 : index
    %8 = vector.load %arg4[%c0_4, %7, %c0_5, %c0_6] : memref<1x1x2x8xf32, #tpu.memory_space<vmem>>, vector<1x1x2x8xf32>
    %9 = vector.shape_cast %8 : vector<1x1x2x8xf32> to vector<2x8xf32>
    %10 = vector.shape_cast %6 : vector<2x8xf32> to vector<1x1x2x8xf32>
    tpu.vector_store %arg4[%c0_4, %7, %c0_5, %c0_6], %10 {strides = array<i32>} : memref<1x1x2x8xf32, #tpu.memory_space<vmem>>, vector<1x1x2x8xf32>,
    %c0_i32 = arith.constant 0 : i32
    %11 = arith.cmpi eq, %arg1, %c0_i32 : i32
    %12 = arith.extui %11 : i1 to i32
    %c0_i32_7 = arith.constant 0 : i32
    %13 = arith.cmpi ne, %12, %c0_i32_7 : i32
    scf.if %13 {
      %c0_8 = arith.constant 0 : index
      %c0_9 = arith.constant 0 : index
      %c0_10 = arith.constant 0 : index
      %c0_11 = arith.constant 0 : index
      %14 = vector.load %arg4[%c0_8, %c0_9, %c0_10, %c0_11] : memref<1x1x2x8xf32, #tpu.memory_space<vmem>>, vector<1x1x2x8xf32>
      %15 = vector.shape_cast %14 : vector<1x1x2x8xf32> to vector<1x2x8xf32>
      %cst_12 = arith.constant dense<0xFF800000> : vector<1x2xf32>
      %16 = vector.multi_reduction <maximumf>, %15, %cst_12 [2] : vector<1x2x8xf32> to vector<1x2xf32>
      %17 = vector.shape_cast %16 : vector<1x2xf32> to vector<1x2x1xf32>
      %cst_13 = arith.constant dense<0xFF800000> : vector<2x1xf32>
      %18 = vector.multi_reduction <maximumf>, %17, %cst_13 [0] : vector<1x2x1xf32> to vector<2x1xf32>
      %19 = vector.shape_cast %18 : vector<2x1xf32> to vector<1x2x1xf32>
      %20 = vector.broadcast %19 : vector<1x2x1xf32> to vector<1x2x8xf32>
      %21 = arith.subf %15, %20 : vector<1x2x8xf32>
      %22 = math.exp %21 : vector<1x2x8xf32>
      %cst_14 = arith.constant dense<0.000000e+00> : vector<1x2xf32>
      %23 = vector.multi_reduction <add>, %22, %cst_14 [2] : vector<1x2x8xf32> to vector<1x2xf32>
      %24 = vector.shape_cast %23 : vector<1x2xf32> to vector<1x2x1xf32>
      %cst_15 = arith.constant dense<0.000000e+00> : vector<2x1xf32>
      %25 = vector.multi_reduction <add>, %24, %cst_15 [0] : vector<1x2x1xf32> to vector<2x1xf32>
      %26 = vector.shape_cast %25 : vector<2x1xf32> to vector<1x2x1xf32>
      %27 = tpu.reciprocal %26 : vector<1x2x1xf32> -> vector<1x2x1xf32>
      %28 = vector.broadcast %27 : vector<1x2x1xf32> to vector<1x2x8xf32>
      %29 = arith.mulf %22, %28 : vector<1x2x8xf32>
      %c0_16 = arith.constant 0 : index
      %c0_17 = arith.constant 0 : index
      %c0_18 = arith.constant 0 : index
      %c0_19 = arith.constant 0 : index
      %30 = vector.load %arg4[%c0_16, %c0_17, %c0_18, %c0_19] : memref<1x1x2x8xf32, #tpu.memory_space<vmem>>, vector<1x1x2x8xf32>
      %31 = vector.shape_cast %30 : vector<1x1x2x8xf32> to vector<1x2x8xf32>
      %32 = vector.shape_cast %29 : vector<1x2x8xf32> to vector<1x1x2x8xf32>
      tpu.vector_store %arg4[%c0_16, %c0_17, %c0_18, %c0_19], %32 {strides = array<i32>} : memref<1x1x2x8xf32, #tpu.memory_space<vmem>>, vector<1x1x2x8xf32>,
    } else {
    }
    return
  }
  func.func @transform_0(%arg0: i32, %arg1: i32) -> (i32, i32) {
    %c0_i32 = arith.constant 0 : i32
    %c0_i32_0 = arith.constant 0 : i32
    return %arg0, %c0_i32 : i32, i32
  }
  func.func @transform_1(%arg0: i32, %arg1: i32) -> (i32, i32, i32) {
    %c0_i32 = arith.constant 0 : i32
    %c0_i32_0 = arith.constant 0 : i32
    return %arg1, %arg0, %c0_i32 : i32, i32, i32
  }
  func.func @transform_2(%arg0: i32, %arg1: i32) -> (i32, i32, i32, i32) {
    %c0_i32 = arith.constant 0 : i32
    %c0_i32_0 = arith.constant 0 : i32
    %c0_i32_1 = arith.constant 0 : i32
    %c0_i32_2 = arith.constant 0 : i32
    return %arg0, %c0_i32, %c0_i32_0, %c0_i32_1 : i32, i32, i32, i32
  }
}

</mosaic_0001>

<bundles_post_ra>
// kernel: tpu_custom_call.1
= control target key start
LH: loop header
LB: loop body
LE: loop exit
PB: predicated region body
PF: predicated region fallthrough
CT: control target
= control target key end

     0   :  { %7 = vsyncpa [#allocation3], 0  ;;  %s331_s0 = inlined_call_operand.hbm [shape: f32[2,32], index: 0, kind: input, shape index: {}]   ;;  %s332_s1 = inlined_call_operand.hbm [shape: f32[8,2,32], index: 1, kind: input, shape index: {}]   ;;  %s333_s2 = inlined_call_operand.hbm [shape: f32[1,1,2,8], index: 2, kind: output, shape index: {}]  }
   0x1   :  { %8 = vsyncpa [#allocation6], 0 }
   0x2   :  { %9 = vsyncpa [#allocation4], 0  ;;  %s15_s11 = sshll.u32 %s331_s0, 4  ;;  %s290_s12 = smov [#allocation2]   ;;  %s16_s11 = int_to_ptr.hbm [resolvable:$true] %s15_s11 }
   0x3   :  { %s17_s13 = sshll.u32 %s290_s12, 4  ;;  %s25_s16 = sshll.u32 %s332_s1, 4  ;;  %s18_s13 = int_to_ptr.vmem [resolvable:$true] %s17_s13  ;;  %s26_s16 = int_to_ptr.hbm [resolvable:$true] %s25_s16 }
   0x4   :  { %20 = dma.hbm_to_vmem [thread:$0]  %s16_s11, 32, %s18_s13, [#allocation3]  }
   0x5   :  { %s291_s17 = smov [#allocation5]   ;;  %s292_s19 = smov 32  }
   0x6   :  { %s27_s18 = sshll.u32 %s291_s17, 4  ;;  %s293_s20 = smov 2   ;;  %s28_s18 = int_to_ptr.vmem [resolvable:$true] %s27_s18 }
   0x7   :  { %33 = dma.hbm_to_vmem [thread:$0]  %s26_s16, 256, %s28_s18, [#allocation6], %s292_s19, %s292_s19, %s293_s20  }
   0x8   :  { %284 = dma.done.wait [#allocation3], 32  }
   0x9   :  { %285 = vsyncadd [#allocation3], 4294967264 }
   0xa   :  { %286 = dma.done.wait [#allocation6], 256  }
   0xb   :  { %287 = vsyncadd [#allocation6], 4294967040  ;;  %vm59_vm0 = vcmask 254976   ;;  %v42_v0 = vld [vmem:[#allocation5] sm:$0x3]  ;;  %v92_v27 = vlaneseq  ;;  %vm102_vm1 = vcmask 1041409  }
   0xc   :  { %v50_v1 = vld [vmem:[#allocation2] sm:$0x3]  ;;  %v44_v2 = vld [vmem:[#allocation5 + $0x4] sm:$0x3]  ;;  %v46_v5 = vld [vmem:[#allocation5 + $0x8] sm:$0x3] }
   0xd   :  { %v51_v3 = vmul.f32 %v50_v1, %v42_v0  ;;  %v53_v4 = vmul.f32 %v50_v1, %v44_v2  ;;  %v55_v6 = vmul.f32 %v50_v1, %v46_v5  ;;  %v43_v7 = vld [vmem:[#allocation5 + $0x2] sm:$0x3]  ;;  %v45_v8 = vld [vmem:[#allocation5 + $0x6] sm:$0x3]  ;;  %v47_v11 = vld [vmem:[#allocation5 + $0xa] sm:$0x3] }
   0xe   :  { %v52_v13 = vmul.f32 %v50_v1, %v43_v7  ;;  %v54_v14 = vmul.f32 %v50_v1, %v45_v8  ;;  %v56_v15 = vmul.f32 %v50_v1, %v47_v11  ;;  %v48_v19 = vld [vmem:[#allocation5 + $0xc] sm:$0x3]  ;;  %v49_v20 = vld [vmem:[#allocation5 + $0xe] sm:$0x3]  ;;  %v93_v29 = vand.u32 127, %v92_v27  ;;  %s294_s0 = smov [#allocation7]  }
   0xf   :  { %v60_v9 = vsel %vm59_vm0, %v51_v3, 0.0  ;;  %v66_v10 = vsel %vm59_vm0, %v53_v4, 0.0  ;;  %v72_v12 = vsel %vm59_vm0, %v55_v6, 0.0  ;;  %v57_v21 = vmul.f32 %v50_v1, %v48_v19  ;;  %s189_s1 = sshll.u32 %s294_s0, 4  ;;  %s191_s23 = sshll.u32 %s333_s2, 4  ;;  %s190_s1 = int_to_ptr.vmem [resolvable:$true] %s189_s1  ;;  %s192_s23 = int_to_ptr.hbm [resolvable:$true] %s191_s23 }
  0x10   :  { %61 = vadd.xlane.f32.xlu0 %v60_v9  ;;  %67 = vadd.xlane.f32.xlu1 %v66_v10  ;;  %v63_v16 = vsel %vm59_vm0, %v52_v13, 0.0  ;;  %v69_v17 = vsel %vm59_vm0, %v54_v14, 0.0  ;;  %v75_v18 = vsel %vm59_vm0, %v56_v15, 0.0  ;;  %v58_v22 = vmul.f32 %v50_v1, %v49_v20 }
  0x11   :  { %73 = vadd.xlane.f32.xlu2 %v72_v12  ;;  %v78_v23 = vsel %vm59_vm0, %v57_v21, 0.0  ;;  %vm104_vm2 = vcmask 1042434   ;;  %vm106_vm3 = vcmask 1043459   ;;  %vm108_vm4 = vcmask 1044484  }
  0x12   :  { %v81_v24 = vsel %vm59_vm0, %v58_v22, 0.0  ;;  %vm110_vm5 = vcmask 1045509   ;;  %vm112_vm6 = vcmask 1046534   ;;  %vm114_vm7 = vcmask 1047559  }
  0x13   :  { %vm151_vm8 = vcmask 58368  }
  0x18   :  { %64 = vadd.xlane.f32.xlu0 %v63_v16  ;;  %70 = vadd.xlane.f32.xlu1 %v69_v17 }
  0x19   :  { %76 = vadd.xlane.f32.xlu2 %v75_v18 }
  0x20   :  { %79 = vadd.xlane.f32.xlu0 %v78_v23  ;;  %82 = vadd.xlane.f32.xlu1 %v81_v24 }
  0x83   :  { %v62_v25 = vpop.xlane.xlu0 %61  ;;  %v68_v26 = vpop.xlane.xlu1 %67 }
  0x84   :  { %v74_v28 = vpop.xlane.xlu2 %73  ;;  %v94_v32 = vperm.slane %v62_v25, %v93_v29  ;;  %v96_v35 = vperm.slane %v68_v26, %v93_v29 }
  0x85   :  { %v98_v39 = vperm.slane %v74_v28, %v93_v29 }
  0x8b   :  { %v65_v30 = vpop.xlane.xlu0 %64  ;;  %v71_v31 = vpop.xlane.xlu1 %70 }
  0x8c   :  { %v95_v33 = vperm.slane %v65_v30, %v93_v29  ;;  %v97_v34 = vperm.slane %v71_v31, %v93_v29  ;;  %v77_v37 = vpop.xlane.xlu2 %76 }
  0x8d   :  { %v99_v41 = vperm.slane %v77_v37, %v93_v29 }
  0x8e   :  { %v103_v36 = vsel %vm102_vm1, %v95_v33, %v94_v32 }
  0x8f   :  { %v105_v38 = vsel %vm104_vm2, %v96_v35, %v103_v36 }
  0x90   :  { %v107_v40 = vsel %vm106_vm3, %v97_v34, %v105_v38 }
  0x91   :  { %v109_v42 = vsel %vm108_vm4, %v98_v39, %v107_v40 }
  0x92   :  { %v111_v47 = vsel %vm110_vm5, %v99_v41, %v109_v42 }
  0x93   :  { %v80_v43 = vpop.xlane.xlu0 %79  ;;  %v83_v44 = vpop.xlane.xlu1 %82 }
  0x94   :  { %v100_v45 = vperm.slane %v80_v43, %v93_v29  ;;  %v101_v46 = vperm.slane %v83_v44, %v93_v29 }
  0x96   :  { %v113_v48 = vsel %vm112_vm6, %v100_v45, %v111_v47 }
  0x97   :  { %v115_v49 = vsel %vm114_vm7, %v101_v46, %v113_v48 }
  0x98   :  { %117 = vxpose.xlu2.b32.start.end [1/1] (short) (narrow) %v115_v49, 8 }
 0x131   :  { %v133_v50 = vpop.trf.xlu2 }
 0x132   :  { %152 = vst.msk [vmem:[#allocation7] sm:$0x3] %vm151_vm8, %v133_v50 }
 0x139   :  { %v157_v51 = vld [vmem:[#allocation7] sm:$0x3] }
 0x13a   :  { %v158_v52 = vsel %vm151_vm8, %v157_v51, -inf }
 0x13b   :  { %159 = vmax.xlane.f32.xlu0 %v158_v52 }
 0x1ae   :  { %v160_v53 = vpop.xlane.xlu0 %159 }
 0x1af   :  { %v161_v54 = vsub.f32 %v157_v51, %v160_v53 }
 0x1b1   :  { %v162_v55 = vmul.f32 1.442695, %v161_v54 }
 0x1b3   :  { %208 = vpow2.f32 %v162_v55 }
 0x1b9   :  { %v209_v56 = vpop.eup %208 }
 0x1ba   :  { %v164_v57 = vsel %vm151_vm8, %v209_v56, 0.0 }
 0x1bb   :  { %165 = vadd.xlane.f32.xlu1 %v164_v57 }
 0x22e   :  { %v166_v58 = vpop.xlane.xlu1 %165 }
 0x22f   :  { %210 = vrcp.f32 %v166_v58  ;;  %v179_v62 = vand.u32 2147483648, %v166_v58  ;;  %v177_v0 = vand.u32 2147483647, %v166_v58  ;;  %vm173_vm10 = vweird.f32 %v166_v58 }
 0x231   :  { %v180_v2 = vor.u32 1.1754944e-38, %v179_v62  ;;  %vm178_vm12 = vcmp.eq.f32.partialorder %v177_v0, 8.507059e+37 }
 0x235   :  { %v211_v59 = vpop.eup %210 }
 0x236   :  { %v169_v60 = vmul.f32 %v211_v59, %v166_v58  ;;  %vm174_vm9 = vweird.f32 %v211_v59 }
 0x237   :  { %vm175_vm11 = vmor %vm173_vm10, %vm174_vm9 }
 0x238   :  { %v170_v61 = vsub.f32 1.0, %v169_v60 }
 0x23a   :  { %v171_v63 = vmul.f32 %v211_v59, %v170_v61 }
 0x23c   :  { %v172_v1 = vadd.f32 %v211_v59, %v171_v63 }
 0x23e   :  { %v176_v3 = vsel %vm175_vm11, %v211_v59, %v172_v1 }
 0x23f   :  { %v181_v4 = vsel %vm178_vm12, %v180_v2, %v176_v3 }
 0x240   :  { %v182_v5 = vmul.f32 %v209_v56, %v181_v4 }
 0x242   :  { %183 = vst.msk [vmem:[#allocation7] sm:$0x3] %vm151_vm8, %v182_v5 }
 0x243   :  { %194 = dma.vmem_to_hbm [thread:$0]  %s190_s1, 32, %s192_s23, [#allocation4]  }
 0x244   :  { %288 = dma.done.wait [#allocation4], 32  }
 0x245   :  { %289 = vsyncadd [#allocation4], 4294967264 }
 0x246   :  { %199 = vsyncpa [#allocation3], 1 }
 0x247   :  { %200 = vsyncpa [#allocation6], 1 }
 0x248   :  { %201 = vsyncpa [#allocation4], 1 }

</bundles_post_ra>
